<compile_context>
chip_gen: v5e
topology: v5e:2x2
jax: 0.10.0
libtpu: 0.0.40
codegen_flags: <defaults>
</compile_context>

<pallas_src>
import math

import jax
import jax.numpy as jnp
from jax.experimental import pallas as pl
from jax.experimental.pallas import tpu as pltpu

LANES = 128
SUBLANES = 8


def _round_up(x, m):
    return ((x + m - 1) // m) * m


def _tile_budget_rows(C, itemsize):
    """Rows per grid step from a ~16 MiB working-set budget (dtype aware).

    Per step ~= double-buffered input (2*itemsize B/elem) + f32 intermediates
    (exp(x - m) and friends, ~8 B/elem).  Capped at 1024 rows so the step also
    fits comfortably inside v7x's 64 MiB VMEM under the 48 MiB scoped limit.
    """
    budget = 16 * 1024 * 1024
    rows = budget // (C * LANES * (2 * itemsize + 8))
    return max(SUBLANES, min(1024, (rows // SUBLANES) * SUBLANES))


def _largest_aligned_divisor(rows, cap):
    """Largest multiple-of-8 divisor of `rows` (a multiple of 8) that is <= cap."""
    q = rows // SUBLANES
    best = SUBLANES
    d = 1
    while d * d <= q:
        if q % d == 0:
            for f in (d, q // d):
                ts = f * SUBLANES
                if best < ts <= cap:
                    best = ts
        d += 1
    return best


def _make_loss_kernel(C, Ts, ignore_label, n_split, tiles_per_split, n_tiles):
    """Kernel factory. All arguments are compile-time constants."""
    use_ignore = ignore_label is not None
    need_guard = n_split * tiles_per_split > n_tiles

    def fold(v):
        # (Ts, 128) -> (8, 128) partial sums via pure VPU adds (free reshape).
        if Ts == SUBLANES:
            return v
        return jnp.sum(v.reshape(Ts // SUBLANES, SUBLANES, LANES), axis=0)

    def kernel(logits_ref, tgt_ref, *out_refs):
        if use_ignore:
            tp_ref, sp_ref, cc_ref, ce_ref, cnt_ref = out_refs
        else:
            tp_ref, sp_ref, cc_ref, ce_ref = out_refs
            cnt_ref = None

        # Zero the resident accumulators on the first row tile of this slab.
        @pl.when(pl.program_id(1) == 0)
        def _init():
            for r in out_refs:
                r[...] = jnp.zeros(r.shape, r.dtype)

        def compute():
            x = logits_ref[...]                       # (C, Ts, 128) input dtype
            tgt = tgt_ref[...]                        # (Ts, 128) int32

            if use_ignore:
                # Fold the mask into the target: the sentinel class C matches
                # no real class, so the one-hot slabs below are pre-masked.
                valid = tgt != jnp.int32(ignore_label)
                tgt_m = jnp.where(valid, tgt, jnp.int32(C))
                validf = valid.astype(jnp.float32)
            else:
                # Padded pixels (if any) already carry the sentinel class C and
                # zero logits; their sum(p)/CE excess is removed analytically
                # in the wrapper, so no in-kernel mask is needed at all.
                tgt_m = tgt
                validf = None

            # Numerically stable softmax over the (leading) class axis.
            m = jnp.max(x, axis=0).astype(jnp.float32)         # (Ts, 128)
            e = jnp.exp(x.astype(jnp.float32) - m)             # (C, Ts, 128) f32
            s = jnp.sum(e, axis=0)                             # (Ts, 128)
            inv_s = pl.reciprocal(s, approx=True)              # stats path (EUP)
            log_s = jnp.log(s)                                 # exact path (CE)
            w = inv_s * validf if use_ignore else inv_s        # once per pixel

            # Per-class Tversky partial sums + CE target-logit gather.
            # Unrolled Python loop: fine for typical segmentation C (<~32).
            logit_t = jnp.zeros((Ts, LANES), x.dtype)
            for c in range(C):
                oh_b = tgt_m == c                              # pre-masked one-hot
                oh_f = oh_b.astype(jnp.float32)
                p = e[c] * w                                   # (masked) softmax prob
                tp_ref[c] += fold(p * oh_f)                    # sum p * oh * mask
                sp_ref[c] += fold(p)                           # sum p * mask
                cc_ref[c] += fold(oh_f)                        # sum oh * mask
                logit_t = jnp.where(oh_b, x[c], logit_t)       # stays in input dtype

            # Cross entropy partial sums: -log softmax at the target class.
            ce_pix = log_s + m - logit_t.astype(jnp.float32)
            if use_ignore:
                ce_pix = ce_pix * validf
                cnt_ref[...] += fold(validf)
            ce_ref[...] += fold(ce_pix)

        if need_guard:
            tile = (pl.program_id(0) % n_split) * tiles_per_split + pl.program_id(1)
            pl.when(tile < n_tiles)(compute)
        else:
            compute()

    return kernel


def region_cluster_tversky_ce_loss(net_output,
                                   target,
                                   weight_ce=1.0,
                                   weight_tversky1=1.0,
                                   weight_tversky2=1.0,
                                   ignore_label=None,
                                   alpha=0.5,
                                   beta=0.5,
                                   smooth=1e-5,
                                   include_background=True,
                                   tile_rows=None):
    """JAX/Pallas equivalent of RegionClusterTversky_CELoss.forward.

    net_output: (B, C, *spatial) logits (any float dtype, NCHW-style).
    target:     (B, 1, *spatial) integer class labels.
    """
    B, C = int(net_output.shape[0]), int(net_output.shape[1])
    spatial = net_output.shape[2:]
    N = math.prod(int(d) for d in spatial)
    assert target.shape[1] == 1, "target must be (B, 1, x, y(, z))"

    itemsize = jnp.dtype(net_output.dtype).itemsize
    ts_budget = _tile_budget_rows(C, itemsize)

    R = -(-N // LANES)                       # number of 128-pixel rows
    R8 = _round_up(R, SUBLANES)

    # --- pick a row-tile size; avoid the full-tensor pad copy when possible ---
    Ts, zero_copy = None, False
    if N == R8 * LANES:                      # (B,C,N) -> (B,C,R8,128) is a free reshape
        if tile_rows is not None:
            if tile_rows % SUBLANES == 0 and R8 % tile_rows == 0:
                Ts, zero_copy = tile_rows, True
        elif R8 <= ts_budget:
            Ts, zero_copy = R8, True
        else:
            d = _largest_aligned_divisor(R8, ts_budget)
            if d >= max(64, ts_budget // 8):
                Ts, zero_copy = d, True

    if zero_copy:
        R_pad = R8
    else:
        if tile_rows is not None:
            Ts = tile_rows
        else:
            n_t = -(-R8 // ts_budget)
            Ts = _round_up(-(-R8 // n_t), SUBLANES)
        R_pad = _round_up(R8, Ts)
    assert Ts % SUBLANES == 0, "tile_rows must be a multiple of 8"
    n_tiles = R_pad // Ts
    pad = R_pad * LANES - N                  # padded pixels per image

    logits = jnp.reshape(net_output, (B, C, N))
    tgt = jnp.reshape(target, (B, N))
    if tgt.dtype != jnp.int32:
        tgt = tgt.astype(jnp.int32)
    if pad:
        # Zero logits => exact uniform softmax at padded pixels; the sentinel
        # target (or ignore_label) keeps them out of tp/fn/CE, and the uniform
        # sum(p)/CE excess is removed analytically in the finalization.
        pad_val = int(ignore_label) if ignore_label is not None else C
        logits = jnp.pad(logits, ((0, 0), (0, 0), (0, pad)))
        tgt = jnp.pad(tgt, ((0, 0), (0, pad)), constant_values=pad_val)
    logits = logits.reshape(B, C, R_pad, LANES)
    tgt = tgt.reshape(B, R_pad, LANES)

    # Optional 2-way row-tile split so both v7x TensorCores are used for odd B.
    n_split = 2 if (B % 2 == 1 and n_tiles >= 2) else 1
    tiles_per_split = -(-n_tiles // n_split)
    need_guard = n_split * tiles_per_split > n_tiles
    G = B * n_split

    def batch_of(g):
        return g if n_split == 1 else g // n_split

    def tile_of(g, n):
        if n_split == 1:
            return n
        t = (g % n_split) * tiles_per_split + n
        # Clamp the (guarded) ragged tail so the DMA stays in bounds; the
        # kernel skips accumulation for those steps.
        return jnp.minimum(t, n_tiles - 1) if need_guard else t

    lg_spec = pl.BlockSpec((None, C, Ts, LANES),
                           lambda g, n: (batch_of(g), 0, tile_of(g, n), 0))
    tg_spec = pl.BlockSpec((None, Ts, LANES),
                           lambda g, n: (batch_of(g), tile_of(g, n), 0))

    acc_cls = jax.ShapeDtypeStruct((G, C, SUBLANES, LANES), jnp.float32)
    acc_px = jax.ShapeDtypeStruct((G, SUBLANES, LANES), jnp.float32)
    cls_spec = pl.BlockSpec((None, C, SUBLANES, LANES), lambda g, n: (g, 0, 0, 0))
    px_spec = pl.BlockSpec((None, SUBLANES, LANES), lambda g, n: (g, 0, 0))

    out_shape = [acc_cls, acc_cls, acc_cls, acc_px]
    out_specs = [cls_spec, cls_spec, cls_spec, px_spec]
    if ignore_label is not None:
        out_shape.append(acc_px)
        out_specs.append(px_spec)

    grid_spec = pltpu.PrefetchScalarGridSpec(
        num_scalar_prefetch=0,
        grid=(G, tiles_per_split),
        in_specs=[lg_spec, tg_spec],
        out_specs=out_specs,
    )

    outs = pl.pallas_call(
        _make_loss_kernel(C, Ts, ignore_label, n_split, tiles_per_split, n_tiles),
        out_shape=tuple(out_shape),
        grid_spec=grid_spec,
        compiler_params=pltpu.CompilerParams(
            dimension_semantics=("parallel", "arbitrary"),
            vmem_limit_bytes=48 * 1024 * 1024),
    )(logits, tgt)

    if ignore_label is not None:
        tp_p, sp_p, cc_p, ce_p, cnt_p = outs
    else:
        tp_p, sp_p, cc_p, ce_p = outs
        cnt_p = None

    # ---- finalization (cheap math in plain JAX) ----
    def red_cls(a):
        return jnp.sum(a.reshape(B, n_split, C, SUBLANES, LANES), axis=(1, 3, 4))

    tp = red_cls(tp_p)                        # (B, C)
    sum_p = red_cls(sp_p)                     # (B, C)
    cls_cnt = red_cls(cc_p)                   # (B, C)
    ce_total = jnp.sum(ce_p)

    if ignore_label is None and pad > 0:
        # Analytic removal of the zero-logit padded pixels: each contributes
        # exactly 1/C to every class's sum(p) and log(C) to the CE sum.
        sum_p = sum_p - jnp.float32(pad) / jnp.float32(C)
        ce_total = ce_total - jnp.float32(B * pad) * jnp.log(jnp.float32(C))

    fp = sum_p - tp
    fn = cls_cnt - tp
    if not include_background:
        tp, fp, fn = tp[:, 1:], fp[:, 1:], fn[:, 1:]
    tversky_index = (tp + smooth) / (tp + alpha * fp + beta * fn + smooth)
    tversky_loss = 1.0 - jnp.mean(tversky_index)

    # Both Tversky terms share the same whole-image statistics (see TODO above).
    tv1 = tversky_loss if weight_tversky1 != 0 else jnp.float32(0.0)
    tv2 = tversky_loss if weight_tversky2 != 0 else jnp.float32(0.0)

    if weight_ce != 0:
        if ignore_label is not None:
            num_fg = jnp.sum(cnt_p)
            ce_loss = jnp.where(num_fg > 0,
                                ce_total / jnp.maximum(num_fg, 1.0),
                                jnp.float32(0.0))
        else:
            ce_loss = ce_total / jnp.float32(B * N)
    else:
        ce_loss = jnp.float32(0.0)

    return weight_ce * ce_loss + weight_tversky1 * tv1 + weight_tversky2 * tv2


def _reference_loss(net_output, target, weight_ce=1.0, weight_tversky1=1.0,
                    weight_tversky2=1.0, ignore_label=None, alpha=0.5, beta=0.5,
                    smooth=1e-5, include_background=True):
    """Pure-JAX reference with identical semantics (for the self-check)."""
    B, C = net_output.shape[:2]
    logits = net_output.reshape(B, C, -1).astype(jnp.float32)
    tgt = target.reshape(B, -1).astype(jnp.int32)
    if ignore_label is not None:
        mask = tgt != ignore_label
        tgt_tv = jnp.where(mask, tgt, 0)
    else:
        mask = jnp.ones_like(tgt, dtype=bool)
        tgt_tv = tgt
    maskf = mask.astype(jnp.float32)[:, None, :]               # (B, 1, N)
    probs = jax.nn.softmax(logits, axis=1)
    oh = jax.nn.one_hot(tgt_tv, C, axis=1, dtype=jnp.float32)  # (B, C, N)
    pm = probs * maskf
    tp = jnp.sum(pm * oh, axis=2)
    fp = jnp.sum(pm * (1.0 - oh), axis=2)
    fn = jnp.sum((1.0 - probs) * oh * maskf, axis=2)
    if not include_background:
        tp, fp, fn = tp[:, 1:], fp[:, 1:], fn[:, 1:]
    tv_idx = (tp + smooth) / (tp + alpha * fp + beta * fn + smooth)
    tv_loss = 1.0 - jnp.mean(tv_idx)
    logp = jax.nn.log_softmax(logits, axis=1)
    ce_pix = -jnp.take_along_axis(logp, tgt_tv[:, None, :], axis=1)[:, 0, :]
    ce_pix = ce_pix * maskf[:, 0, :]
    cnt = jnp.sum(maskf)
    if weight_ce != 0:
        if ignore_label is not None:
            ce_loss = jnp.where(cnt > 0, jnp.sum(ce_pix) / jnp.maximum(cnt, 1.0), 0.0)
        else:
            ce_loss = jnp.sum(ce_pix) / cnt
    else:
        ce_loss = jnp.float32(0.0)
    tv1 = tv_loss if weight_tversky1 != 0 else 0.0
    tv2 = tv_loss if weight_tversky2 != 0 else 0.0
    return weight_ce * ce_loss + weight_tversky1 * tv1 + weight_tversky2 * tv2


if __name__ == "__main__":
    key = jax.random.PRNGKey(0)
    k1, k2, k3, k4, k5, k6 = jax.random.split(key, 6)

    # Case 1: small unaligned spatial size -> padded path with analytic pad
    # correction (no ignore label, no in-kernel mask).
    B, C, H, W = 2, 4, 16, 16
    x1 = jax.random.normal(k1, (B, C, H, W), dtype=jnp.float32)
    t1 = jax.random.randint(k2, (B, 1, H, W), 0, C, dtype=jnp.int32)
    out1 = jax.block_until_ready(region_cluster_tversky_ce_loss(x1, t1))
    ref1 = _reference_loss(x1, t1)
    assert jnp.isfinite(out1), "loss is not finite"
    assert jnp.allclose(out1, ref1, rtol=5e-3, atol=5e-3), (float(out1), float(ref1))

    # Case 2: ignore label (sentinel mask folding + CE gating path).
    out2 = jax.block_until_ready(region_cluster_tversky_ce_loss(
        x1, t1, weight_tversky2=0.5, ignore_label=2))
    ref2 = _reference_loss(x1, t1, weight_tversky2=0.5, ignore_label=2)
    assert jnp.isfinite(out2), "loss is not finite"
    assert jnp.allclose(out2, ref2, rtol=5e-3, atol=5e-3), (float(out2), float(ref2))

    # Case 3: aligned spatial size (zero-copy, no jnp.pad), odd batch -> 2-way
    # row-tile split with a guarded ragged last tile.
    x3 = jax.random.normal(k3, (1, 3, 48, 64), dtype=jnp.float32)
    t3 = jax.random.randint(k4, (1, 1, 48, 64), 0, 3, dtype=jnp.int32)
    out3 = jax.block_until_ready(region_cluster_tversky_ce_loss(x3, t3, tile_rows=8))
    ref3 = _reference_loss(x3, t3)
    assert jnp.isfinite(out3), "loss is not finite"
    assert jnp.allclose(out3, ref3, rtol=5e-3, atol=5e-3), (float(out3), float(ref3))

    # Case 4: bf16 logits (in-kernel upcast, bf16 target-logit select) + ignore.
    x4 = jax.random.normal(k5, (2, 4, 32, 32), dtype=jnp.bfloat16)
    t4 = jax.random.randint(k6, (2, 1, 32, 32), 0, 4, dtype=jnp.int32)
    out4 = jax.block_until_ready(region_cluster_tversky_ce_loss(x4, t4, ignore_label=3))
    ref4 = _reference_loss(x4, t4, ignore_label=3)
    assert jnp.isfinite(out4), "loss is not finite"
    assert jnp.allclose(out4, ref4, rtol=5e-3, atol=5e-3), (float(out4), float(ref4))

    print("KERNEL_OK")
</pallas_src>

<mosaic_0001>
module attributes {stable_mosaic.version = 11 : i64} {
  func.func @kernel(%arg0: i32, %arg1: i32, %arg2: memref<1x4x8x128xf32, #tpu.memory_space<vmem>>, %arg3: memref<1x8x128xi32, #tpu.memory_space<vmem>>, %arg4: memref<1x4x8x128xf32, #tpu.memory_space<vmem>>, %arg5: memref<1x4x8x128xf32, #tpu.memory_space<vmem>>, %arg6: memref<1x4x8x128xf32, #tpu.memory_space<vmem>>, %arg7: memref<1x8x128xf32, #tpu.memory_space<vmem>>) attributes {dimension_semantics = [#tpu.dimension_semantics<parallel>, #tpu.dimension_semantics<arbitrary>], iteration_bounds = array<i64: 2, 1>, scalar_prefetch = 0 : i64, scratch_operands = 0 : i64, tpu.core_type = #tpu.core_type<tc>, window_params = [{transform_indices = @transform_0, window_bounds = array<i64: 1, 4, 8, 128>}, {transform_indices = @transform_1, window_bounds = array<i64: 1, 8, 128>}, {transform_indices = @transform_2, window_bounds = array<i64: 1, 4, 8, 128>}, {transform_indices = @transform_3, window_bounds = array<i64: 1, 4, 8, 128>}, {transform_indices = @transform_4, window_bounds = array<i64: 1, 4, 8, 128>}, {transform_indices = @transform_5, window_bounds = array<i64: 1, 8, 128>}]} {
    %c0_i32 = arith.constant 0 : i32
    %0 = arith.cmpi eq, %arg1, %c0_i32 : i32
    %1 = arith.extui %0 : i1 to i32
    %c0_i32_0 = arith.constant 0 : i32
    %2 = arith.cmpi ne, %1, %c0_i32_0 : i32
    scf.if %2 {
      %cst_109 = arith.constant 0.000000e+00 : f32
      %140 = vector.broadcast %cst_109 : f32 to vector<4x8x128xf32>
      %c0_110 = arith.constant 0 : index
      %c0_111 = arith.constant 0 : index
      %c0_112 = arith.constant 0 : index
      %c0_113 = arith.constant 0 : index
      %141 = vector.load %arg4[%c0_110, %c0_111, %c0_112, %c0_113] : memref<1x4x8x128xf32, #tpu.memory_space<vmem>>, vector<1x4x8x128xf32>
      %142 = vector.shape_cast %141 : vector<1x4x8x128xf32> to vector<4x8x128xf32>
      %143 = vector.shape_cast %140 : vector<4x8x128xf32> to vector<1x4x8x128xf32>
      tpu.vector_store %arg4[%c0_110, %c0_111, %c0_112, %c0_113], %143 {strides = array<i32>} : memref<1x4x8x128xf32, #tpu.memory_space<vmem>>, vector<1x4x8x128xf32>,
      %cst_114 = arith.constant 0.000000e+00 : f32
      %144 = vector.broadcast %cst_114 : f32 to vector<4x8x128xf32>
      %c0_115 = arith.constant 0 : index
      %c0_116 = arith.constant 0 : index
      %c0_117 = arith.constant 0 : index
      %c0_118 = arith.constant 0 : index
      %145 = vector.load %arg5[%c0_115, %c0_116, %c0_117, %c0_118] : memref<1x4x8x128xf32, #tpu.memory_space<vmem>>, vector<1x4x8x128xf32>
      %146 = vector.shape_cast %145 : vector<1x4x8x128xf32> to vector<4x8x128xf32>
      %147 = vector.shape_cast %144 : vector<4x8x128xf32> to vector<1x4x8x128xf32>
      tpu.vector_store %arg5[%c0_115, %c0_116, %c0_117, %c0_118], %147 {strides = array<i32>} : memref<1x4x8x128xf32, #tpu.memory_space<vmem>>, vector<1x4x8x128xf32>,
      %cst_119 = arith.constant 0.000000e+00 : f32
      %148 = vector.broadcast %cst_119 : f32 to vector<4x8x128xf32>
      %c0_120 = arith.constant 0 : index
      %c0_121 = arith.constant 0 : index
      %c0_122 = arith.constant 0 : index
      %c0_123 = arith.constant 0 : index
      %149 = vector.load %arg6[%c0_120, %c0_121, %c0_122, %c0_123] : memref<1x4x8x128xf32, #tpu.memory_space<vmem>>, vector<1x4x8x128xf32>
      %150 = vector.shape_cast %149 : vector<1x4x8x128xf32> to vector<4x8x128xf32>
      %151 = vector.shape_cast %148 : vector<4x8x128xf32> to vector<1x4x8x128xf32>
      tpu.vector_store %arg6[%c0_120, %c0_121, %c0_122, %c0_123], %151 {strides = array<i32>} : memref<1x4x8x128xf32, #tpu.memory_space<vmem>>, vector<1x4x8x128xf32>,
      %cst_124 = arith.constant 0.000000e+00 : f32
      %152 = vector.broadcast %cst_124 : f32 to vector<8x128xf32>
      %c0_125 = arith.constant 0 : index
      %c0_126 = arith.constant 0 : index
      %c0_127 = arith.constant 0 : index
      %153 = vector.load %arg7[%c0_125, %c0_126, %c0_127] : memref<1x8x128xf32, #tpu.memory_space<vmem>>, vector<1x8x128xf32>
      %154 = vector.shape_cast %153 : vector<1x8x128xf32> to vector<8x128xf32>
      %155 = vector.shape_cast %152 : vector<8x128xf32> to vector<1x8x128xf32>
      tpu.vector_store %arg7[%c0_125, %c0_126, %c0_127], %155 {strides = array<i32>} : memref<1x8x128xf32, #tpu.memory_space<vmem>>, vector<1x8x128xf32>,
    } else {
    }
    %c0 = arith.constant 0 : index
    %c0_1 = arith.constant 0 : index
    %c0_2 = arith.constant 0 : index
    %c0_3 = arith.constant 0 : index
    %3 = vector.load %arg2[%c0, %c0_1, %c0_2, %c0_3] : memref<1x4x8x128xf32, #tpu.memory_space<vmem>>, vector<1x4x8x128xf32>
    %4 = vector.shape_cast %3 : vector<1x4x8x128xf32> to vector<4x8x128xf32>
    %c0_4 = arith.constant 0 : index
    %c0_5 = arith.constant 0 : index
    %c0_6 = arith.constant 0 : index
    %5 = vector.load %arg3[%c0_4, %c0_5, %c0_6] : memref<1x8x128xi32, #tpu.memory_space<vmem>>, vector<1x8x128xi32>
    %6 = vector.shape_cast %5 : vector<1x8x128xi32> to vector<8x128xi32>
    %cst = arith.constant dense<0xFF800000> : vector<8x128xf32>
    %7 = vector.multi_reduction <maximumf>, %4, %cst [0] : vector<4x8x128xf32> to vector<8x128xf32>
    %8 = vector.shape_cast %7 : vector<8x128xf32> to vector<1x8x128xf32>
    %9 = vector.broadcast %8 : vector<1x8x128xf32> to vector<4x8x128xf32>
    %10 = arith.subf %4, %9 : vector<4x8x128xf32>
    %11 = math.exp %10 : vector<4x8x128xf32>
    %cst_7 = arith.constant dense<0.000000e+00> : vector<8x128xf32>
    %12 = vector.multi_reduction <add>, %11, %cst_7 [0] : vector<4x8x128xf32> to vector<8x128xf32>
    %13 = tpu.reciprocal %12 {approx = true} : vector<8x128xf32> -> vector<8x128xf32>
    %14 = math.log %12 : vector<8x128xf32>
    %cst_8 = arith.constant 0.000000e+00 : f32
    %15 = vector.broadcast %cst_8 : f32 to vector<8x128xf32>
    %c0_i32_9 = arith.constant 0 : i32
    %16 = vector.broadcast %c0_i32_9 : i32 to vector<8x128xi32>
    %17 = arith.cmpi eq, %6, %16 : vector<8x128xi32>
    %18 = arith.extui %17 : vector<8x128xi1> to vector<8x128xi32>
    %19 = arith.sitofp %18 : vector<8x128xi32> to vector<8x128xf32>
    %20 = vector.extract_strided_slice %11 {offsets = [0, 0, 0], sizes = [1, 8, 128], strides = [1, 1, 1]} : vector<4x8x128xf32> to vector<1x8x128xf32>
    %21 = vector.shape_cast %20 : vector<1x8x128xf32> to vector<8x128xf32>
    %22 = arith.mulf %21, %13 : vector<8x128xf32>
    %c0_10 = arith.constant 0 : index
    %c0_11 = arith.constant 0 : index
    %c0_12 = arith.constant 0 : index
    %c0_13 = arith.constant 0 : index
    %23 = vector.load %arg4[%c0_10, %c0_11, %c0_12, %c0_13] : memref<1x4x8x128xf32, #tpu.memory_space<vmem>>, vector<1x1x8x128xf32>
    %24 = vector.shape_cast %23 : vector<1x1x8x128xf32> to vector<8x128xf32>
    %25 = arith.mulf %22, %19 : vector<8x128xf32>
    %26 = arith.addf %24, %25 : vector<8x128xf32>
    %c0_14 = arith.constant 0 : index
    %c0_15 = arith.constant 0 : index
    %c0_16 = arith.constant 0 : index
    %c0_17 = arith.constant 0 : index
    %27 = vector.load %arg4[%c0_14, %c0_15, %c0_16, %c0_17] : memref<1x4x8x128xf32, #tpu.memory_space<vmem>>, vector<1x1x8x128xf32>
    %28 = vector.shape_cast %27 : vector<1x1x8x128xf32> to vector<8x128xf32>
    %29 = vector.shape_cast %26 : vector<8x128xf32> to vector<1x1x8x128xf32>
    tpu.vector_store %arg4[%c0_14, %c0_15, %c0_16, %c0_17], %29 {strides = array<i32>} : memref<1x4x8x128xf32, #tpu.memory_space<vmem>>, vector<1x1x8x128xf32>,
    %c0_18 = arith.constant 0 : index
    %c0_19 = arith.constant 0 : index
    %c0_20 = arith.constant 0 : index
    %c0_21 = arith.constant 0 : index
    %30 = vector.load %arg5[%c0_18, %c0_19, %c0_20, %c0_21] : memref<1x4x8x128xf32, #tpu.memory_space<vmem>>, vector<1x1x8x128xf32>
    %31 = vector.shape_cast %30 : vector<1x1x8x128xf32> to vector<8x128xf32>
    %32 = arith.addf %31, %22 : vector<8x128xf32>
    %c0_22 = arith.constant 0 : index
    %c0_23 = arith.constant 0 : index
    %c0_24 = arith.constant 0 : index
    %c0_25 = arith.constant 0 : index
    %33 = vector.load %arg5[%c0_22, %c0_23, %c0_24, %c0_25] : memref<1x4x8x128xf32, #tpu.memory_space<vmem>>, vector<1x1x8x128xf32>
    %34 = vector.shape_cast %33 : vector<1x1x8x128xf32> to vector<8x128xf32>
    %35 = vector.shape_cast %32 : vector<8x128xf32> to vector<1x1x8x128xf32>
    tpu.vector_store %arg5[%c0_22, %c0_23, %c0_24, %c0_25], %35 {strides = array<i32>} : memref<1x4x8x128xf32, #tpu.memory_space<vmem>>, vector<1x1x8x128xf32>,
    %c0_26 = arith.constant 0 : index
    %c0_27 = arith.constant 0 : index
    %c0_28 = arith.constant 0 : index
    %c0_29 = arith.constant 0 : index
    %36 = vector.load %arg6[%c0_26, %c0_27, %c0_28, %c0_29] : memref<1x4x8x128xf32, #tpu.memory_space<vmem>>, vector<1x1x8x128xf32>
    %37 = vector.shape_cast %36 : vector<1x1x8x128xf32> to vector<8x128xf32>
    %38 = arith.addf %37, %19 : vector<8x128xf32>
    %c0_30 = arith.constant 0 : index
    %c0_31 = arith.constant 0 : index
    %c0_32 = arith.constant 0 : index
    %c0_33 = arith.constant 0 : index
    %39 = vector.load %arg6[%c0_30, %c0_31, %c0_32, %c0_33] : memref<1x4x8x128xf32, #tpu.memory_space<vmem>>, vector<1x1x8x128xf32>
    %40 = vector.shape_cast %39 : vector<1x1x8x128xf32> to vector<8x128xf32>
    %41 = vector.shape_cast %38 : vector<8x128xf32> to vector<1x1x8x128xf32>
    tpu.vector_store %arg6[%c0_30, %c0_31, %c0_32, %c0_33], %41 {strides = array<i32>} : memref<1x4x8x128xf32, #tpu.memory_space<vmem>>, vector<1x1x8x128xf32>,
    %42 = vector.extract_strided_slice %4 {offsets = [0, 0, 0], sizes = [1, 8, 128], strides = [1, 1, 1]} : vector<4x8x128xf32> to vector<1x8x128xf32>
    %43 = vector.shape_cast %42 : vector<1x8x128xf32> to vector<8x128xf32>
    %44 = arith.select %17, %43, %15 : vector<8x128xi1>, vector<8x128xf32>
    %c1_i32 = arith.constant 1 : i32
    %45 = vector.broadcast %c1_i32 : i32 to vector<8x128xi32>
    %46 = arith.cmpi eq, %6, %45 : vector<8x128xi32>
    %47 = arith.extui %46 : vector<8x128xi1> to vector<8x128xi32>
    %48 = arith.sitofp %47 : vector<8x128xi32> to vector<8x128xf32>
    %49 = vector.extract_strided_slice %11 {offsets = [1, 0, 0], sizes = [1, 8, 128], strides = [1, 1, 1]} : vector<4x8x128xf32> to vector<1x8x128xf32>
    %50 = vector.shape_cast %49 : vector<1x8x128xf32> to vector<8x128xf32>
    %51 = arith.mulf %50, %13 : vector<8x128xf32>
    %c0_34 = arith.constant 0 : index
    %c1 = arith.constant 1 : index
    %c0_35 = arith.constant 0 : index
    %c0_36 = arith.constant 0 : index
    %52 = vector.load %arg4[%c0_34, %c1, %c0_35, %c0_36] : memref<1x4x8x128xf32, #tpu.memory_space<vmem>>, vector<1x1x8x128xf32>
    %53 = vector.shape_cast %52 : vector<1x1x8x128xf32> to vector<8x128xf32>
    %54 = arith.mulf %51, %48 : vector<8x128xf32>
    %55 = arith.addf %53, %54 : vector<8x128xf32>
    %c0_37 = arith.constant 0 : index
    %c1_38 = arith.constant 1 : index
    %c0_39 = arith.constant 0 : index
    %c0_40 = arith.constant 0 : index
    %56 = vector.load %arg4[%c0_37, %c1_38, %c0_39, %c0_40] : memref<1x4x8x128xf32, #tpu.memory_space<vmem>>, vector<1x1x8x128xf32>
    %57 = vector.shape_cast %56 : vector<1x1x8x128xf32> to vector<8x128xf32>
    %58 = vector.shape_cast %55 : vector<8x128xf32> to vector<1x1x8x128xf32>
    tpu.vector_store %arg4[%c0_37, %c1_38, %c0_39, %c0_40], %58 {strides = array<i32>} : memref<1x4x8x128xf32, #tpu.memory_space<vmem>>, vector<1x1x8x128xf32>,
    %c0_41 = arith.constant 0 : index
    %c1_42 = arith.constant 1 : index
    %c0_43 = arith.constant 0 : index
    %c0_44 = arith.constant 0 : index
    %59 = vector.load %arg5[%c0_41, %c1_42, %c0_43, %c0_44] : memref<1x4x8x128xf32, #tpu.memory_space<vmem>>, vector<1x1x8x128xf32>
    %60 = vector.shape_cast %59 : vector<1x1x8x128xf32> to vector<8x128xf32>
    %61 = arith.addf %60, %51 : vector<8x128xf32>
    %c0_45 = arith.constant 0 : index
    %c1_46 = arith.constant 1 : index
    %c0_47 = arith.constant 0 : index
    %c0_48 = arith.constant 0 : index
    %62 = vector.load %arg5[%c0_45, %c1_46, %c0_47, %c0_48] : memref<1x4x8x128xf32, #tpu.memory_space<vmem>>, vector<1x1x8x128xf32>
    %63 = vector.shape_cast %62 : vector<1x1x8x128xf32> to vector<8x128xf32>
    %64 = vector.shape_cast %61 : vector<8x128xf32> to vector<1x1x8x128xf32>
    tpu.vector_store %arg5[%c0_45, %c1_46, %c0_47, %c0_48], %64 {strides = array<i32>} : memref<1x4x8x128xf32, #tpu.memory_space<vmem>>, vector<1x1x8x128xf32>,
    %c0_49 = arith.constant 0 : index
    %c1_50 = arith.constant 1 : index
    %c0_51 = arith.constant 0 : index
    %c0_52 = arith.constant 0 : index
    %65 = vector.load %arg6[%c0_49, %c1_50, %c0_51, %c0_52] : memref<1x4x8x128xf32, #tpu.memory_space<vmem>>, vector<1x1x8x128xf32>
    %66 = vector.shape_cast %65 : vector<1x1x8x128xf32> to vector<8x128xf32>
    %67 = arith.addf %66, %48 : vector<8x128xf32>
    %c0_53 = arith.constant 0 : index
    %c1_54 = arith.constant 1 : index
    %c0_55 = arith.constant 0 : index
    %c0_56 = arith.constant 0 : index
    %68 = vector.load %arg6[%c0_53, %c1_54, %c0_55, %c0_56] : memref<1x4x8x128xf32, #tpu.memory_space<vmem>>, vector<1x1x8x128xf32>
    %69 = vector.shape_cast %68 : vector<1x1x8x128xf32> to vector<8x128xf32>
    %70 = vector.shape_cast %67 : vector<8x128xf32> to vector<1x1x8x128xf32>
    tpu.vector_store %arg6[%c0_53, %c1_54, %c0_55, %c0_56], %70 {strides = array<i32>} : memref<1x4x8x128xf32, #tpu.memory_space<vmem>>, vector<1x1x8x128xf32>,
    %71 = vector.extract_strided_slice %4 {offsets = [1, 0, 0], sizes = [1, 8, 128], strides = [1, 1, 1]} : vector<4x8x128xf32> to vector<1x8x128xf32>
    %72 = vector.shape_cast %71 : vector<1x8x128xf32> to vector<8x128xf32>
    %73 = arith.select %46, %72, %44 : vector<8x128xi1>, vector<8x128xf32>
    %c2_i32 = arith.constant 2 : i32
    %74 = vector.broadcast %c2_i32 : i32 to vector<8x128xi32>
    %75 = arith.cmpi eq, %6, %74 : vector<8x128xi32>
    %76 = arith.extui %75 : vector<8x128xi1> to vector<8x128xi32>
    %77 = arith.sitofp %76 : vector<8x128xi32> to vector<8x128xf32>
    %78 = vector.extract_strided_slice %11 {offsets = [2, 0, 0], sizes = [1, 8, 128], strides = [1, 1, 1]} : vector<4x8x128xf32> to vector<1x8x128xf32>
    %79 = vector.shape_cast %78 : vector<1x8x128xf32> to vector<8x128xf32>
    %80 = arith.mulf %79, %13 : vector<8x128xf32>
    %c0_57 = arith.constant 0 : index
    %c2 = arith.constant 2 : index
    %c0_58 = arith.constant 0 : index
    %c0_59 = arith.constant 0 : index
    %81 = vector.load %arg4[%c0_57, %c2, %c0_58, %c0_59] : memref<1x4x8x128xf32, #tpu.memory_space<vmem>>, vector<1x1x8x128xf32>
    %82 = vector.shape_cast %81 : vector<1x1x8x128xf32> to vector<8x128xf32>
    %83 = arith.mulf %80, %77 : vector<8x128xf32>
    %84 = arith.addf %82, %83 : vector<8x128xf32>
    %c0_60 = arith.constant 0 : index
    %c2_61 = arith.constant 2 : index
    %c0_62 = arith.constant 0 : index
    %c0_63 = arith.constant 0 : index
    %85 = vector.load %arg4[%c0_60, %c2_61, %c0_62, %c0_63] : memref<1x4x8x128xf32, #tpu.memory_space<vmem>>, vector<1x1x8x128xf32>
    %86 = vector.shape_cast %85 : vector<1x1x8x128xf32> to vector<8x128xf32>
    %87 = vector.shape_cast %84 : vector<8x128xf32> to vector<1x1x8x128xf32>
    tpu.vector_store %arg4[%c0_60, %c2_61, %c0_62, %c0_63], %87 {strides = array<i32>} : memref<1x4x8x128xf32, #tpu.memory_space<vmem>>, vector<1x1x8x128xf32>,
    %c0_64 = arith.constant 0 : index
    %c2_65 = arith.constant 2 : index
    %c0_66 = arith.constant 0 : index
    %c0_67 = arith.constant 0 : index
    %88 = vector.load %arg5[%c0_64, %c2_65, %c0_66, %c0_67] : memref<1x4x8x128xf32, #tpu.memory_space<vmem>>, vector<1x1x8x128xf32>
    %89 = vector.shape_cast %88 : vector<1x1x8x128xf32> to vector<8x128xf32>
    %90 = arith.addf %89, %80 : vector<8x128xf32>
    %c0_68 = arith.constant 0 : index
    %c2_69 = arith.constant 2 : index
    %c0_70 = arith.constant 0 : index
    %c0_71 = arith.constant 0 : index
    %91 = vector.load %arg5[%c0_68, %c2_69, %c0_70, %c0_71] : memref<1x4x8x128xf32, #tpu.memory_space<vmem>>, vector<1x1x8x128xf32>
    %92 = vector.shape_cast %91 : vector<1x1x8x128xf32> to vector<8x128xf32>
    %93 = vector.shape_cast %90 : vector<8x128xf32> to vector<1x1x8x128xf32>
    tpu.vector_store %arg5[%c0_68, %c2_69, %c0_70, %c0_71], %93 {strides = array<i32>} : memref<1x4x8x128xf32, #tpu.memory_space<vmem>>, vector<1x1x8x128xf32>,
    %c0_72 = arith.constant 0 : index
    %c2_73 = arith.constant 2 : index
    %c0_74 = arith.constant 0 : index
    %c0_75 = arith.constant 0 : index
    %94 = vector.load %arg6[%c0_72, %c2_73, %c0_74, %c0_75] : memref<1x4x8x128xf32, #tpu.memory_space<vmem>>, vector<1x1x8x128xf32>
    %95 = vector.shape_cast %94 : vector<1x1x8x128xf32> to vector<8x128xf32>
    %96 = arith.addf %95, %77 : vector<8x128xf32>
    %c0_76 = arith.constant 0 : index
    %c2_77 = arith.constant 2 : index
    %c0_78 = arith.constant 0 : index
    %c0_79 = arith.constant 0 : index
    %97 = vector.load %arg6[%c0_76, %c2_77, %c0_78, %c0_79] : memref<1x4x8x128xf32, #tpu.memory_space<vmem>>, vector<1x1x8x128xf32>
    %98 = vector.shape_cast %97 : vector<1x1x8x128xf32> to vector<8x128xf32>
    %99 = vector.shape_cast %96 : vector<8x128xf32> to vector<1x1x8x128xf32>
    tpu.vector_store %arg6[%c0_76, %c2_77, %c0_78, %c0_79], %99 {strides = array<i32>} : memref<1x4x8x128xf32, #tpu.memory_space<vmem>>, vector<1x1x8x128xf32>,
    %100 = vector.extract_strided_slice %4 {offsets = [2, 0, 0], sizes = [1, 8, 128], strides = [1, 1, 1]} : vector<4x8x128xf32> to vector<1x8x128xf32>
    %101 = vector.shape_cast %100 : vector<1x8x128xf32> to vector<8x128xf32>
    %102 = arith.select %75, %101, %73 : vector<8x128xi1>, vector<8x128xf32>
    %c3_i32 = arith.constant 3 : i32
    %103 = vector.broadcast %c3_i32 : i32 to vector<8x128xi32>
    %104 = arith.cmpi eq, %6, %103 : vector<8x128xi32>
    %105 = arith.extui %104 : vector<8x128xi1> to vector<8x128xi32>
    %106 = arith.sitofp %105 : vector<8x128xi32> to vector<8x128xf32>
    %107 = vector.extract_strided_slice %11 {offsets = [3, 0, 0], sizes = [1, 8, 128], strides = [1, 1, 1]} : vector<4x8x128xf32> to vector<1x8x128xf32>
    %108 = vector.shape_cast %107 : vector<1x8x128xf32> to vector<8x128xf32>
    %109 = arith.mulf %108, %13 : vector<8x128xf32>
    %c0_80 = arith.constant 0 : index
    %c3 = arith.constant 3 : index
    %c0_81 = arith.constant 0 : index
    %c0_82 = arith.constant 0 : index
    %110 = vector.load %arg4[%c0_80, %c3, %c0_81, %c0_82] : memref<1x4x8x128xf32, #tpu.memory_space<vmem>>, vector<1x1x8x128xf32>
    %111 = vector.shape_cast %110 : vector<1x1x8x128xf32> to vector<8x128xf32>
    %112 = arith.mulf %109, %106 : vector<8x128xf32>
    %113 = arith.addf %111, %112 : vector<8x128xf32>
    %c0_83 = arith.constant 0 : index
    %c3_84 = arith.constant 3 : index
    %c0_85 = arith.constant 0 : index
    %c0_86 = arith.constant 0 : index
    %114 = vector.load %arg4[%c0_83, %c3_84, %c0_85, %c0_86] : memref<1x4x8x128xf32, #tpu.memory_space<vmem>>, vector<1x1x8x128xf32>
    %115 = vector.shape_cast %114 : vector<1x1x8x128xf32> to vector<8x128xf32>
    %116 = vector.shape_cast %113 : vector<8x128xf32> to vector<1x1x8x128xf32>
    tpu.vector_store %arg4[%c0_83, %c3_84, %c0_85, %c0_86], %116 {strides = array<i32>} : memref<1x4x8x128xf32, #tpu.memory_space<vmem>>, vector<1x1x8x128xf32>,
    %c0_87 = arith.constant 0 : index
    %c3_88 = arith.constant 3 : index
    %c0_89 = arith.constant 0 : index
    %c0_90 = arith.constant 0 : index
    %117 = vector.load %arg5[%c0_87, %c3_88, %c0_89, %c0_90] : memref<1x4x8x128xf32, #tpu.memory_space<vmem>>, vector<1x1x8x128xf32>
    %118 = vector.shape_cast %117 : vector<1x1x8x128xf32> to vector<8x128xf32>
    %119 = arith.addf %118, %109 : vector<8x128xf32>
    %c0_91 = arith.constant 0 : index
    %c3_92 = arith.constant 3 : index
    %c0_93 = arith.constant 0 : index
    %c0_94 = arith.constant 0 : index
    %120 = vector.load %arg5[%c0_91, %c3_92, %c0_93, %c0_94] : memref<1x4x8x128xf32, #tpu.memory_space<vmem>>, vector<1x1x8x128xf32>
    %121 = vector.shape_cast %120 : vector<1x1x8x128xf32> to vector<8x128xf32>
    %122 = vector.shape_cast %119 : vector<8x128xf32> to vector<1x1x8x128xf32>
    tpu.vector_store %arg5[%c0_91, %c3_92, %c0_93, %c0_94], %122 {strides = array<i32>} : memref<1x4x8x128xf32, #tpu.memory_space<vmem>>, vector<1x1x8x128xf32>,
    %c0_95 = arith.constant 0 : index
    %c3_96 = arith.constant 3 : index
    %c0_97 = arith.constant 0 : index
    %c0_98 = arith.constant 0 : index
    %123 = vector.load %arg6[%c0_95, %c3_96, %c0_97, %c0_98] : memref<1x4x8x128xf32, #tpu.memory_space<vmem>>, vector<1x1x8x128xf32>
    %124 = vector.shape_cast %123 : vector<1x1x8x128xf32> to vector<8x128xf32>
    %125 = arith.addf %124, %106 : vector<8x128xf32>
    %c0_99 = arith.constant 0 : index
    %c3_100 = arith.constant 3 : index
    %c0_101 = arith.constant 0 : index
    %c0_102 = arith.constant 0 : index
    %126 = vector.load %arg6[%c0_99, %c3_100, %c0_101, %c0_102] : memref<1x4x8x128xf32, #tpu.memory_space<vmem>>, vector<1x1x8x128xf32>
    %127 = vector.shape_cast %126 : vector<1x1x8x128xf32> to vector<8x128xf32>
    %128 = vector.shape_cast %125 : vector<8x128xf32> to vector<1x1x8x128xf32>
    tpu.vector_store %arg6[%c0_99, %c3_100, %c0_101, %c0_102], %128 {strides = array<i32>} : memref<1x4x8x128xf32, #tpu.memory_space<vmem>>, vector<1x1x8x128xf32>,
    %129 = vector.extract_strided_slice %4 {offsets = [3, 0, 0], sizes = [1, 8, 128], strides = [1, 1, 1]} : vector<4x8x128xf32> to vector<1x8x128xf32>
    %130 = vector.shape_cast %129 : vector<1x8x128xf32> to vector<8x128xf32>
    %131 = arith.select %104, %130, %102 : vector<8x128xi1>, vector<8x128xf32>
    %132 = arith.addf %14, %7 : vector<8x128xf32>
    %133 = arith.subf %132, %131 : vector<8x128xf32>
    %c0_103 = arith.constant 0 : index
    %c0_104 = arith.constant 0 : index
    %c0_105 = arith.constant 0 : index
    %134 = vector.load %arg7[%c0_103, %c0_104, %c0_105] : memref<1x8x128xf32, #tpu.memory_space<vmem>>, vector<1x8x128xf32>
    %135 = vector.shape_cast %134 : vector<1x8x128xf32> to vector<8x128xf32>
    %136 = arith.addf %135, %133 : vector<8x128xf32>
    %c0_106 = arith.constant 0 : index
    %c0_107 = arith.constant 0 : index
    %c0_108 = arith.constant 0 : index
    %137 = vector.load %arg7[%c0_106, %c0_107, %c0_108] : memref<1x8x128xf32, #tpu.memory_space<vmem>>, vector<1x8x128xf32>
    %138 = vector.shape_cast %137 : vector<1x8x128xf32> to vector<8x128xf32>
    %139 = vector.shape_cast %136 : vector<8x128xf32> to vector<1x8x128xf32>
    tpu.vector_store %arg7[%c0_106, %c0_107, %c0_108], %139 {strides = array<i32>} : memref<1x8x128xf32, #tpu.memory_space<vmem>>, vector<1x8x128xf32>,
    return
  }
  func.func @transform_0(%arg0: i32, %arg1: i32) -> (i32, i32, i32, i32) {
    %c0_i32 = arith.constant 0 : i32
    %c0_i32_0 = arith.constant 0 : i32
    %c0_i32_1 = arith.constant 0 : i32
    return %arg0, %c0_i32, %arg1, %c0_i32_0 : i32, i32, i32, i32
  }
  func.func @transform_1(%arg0: i32, %arg1: i32) -> (i32, i32, i32) {
    %c0_i32 = arith.constant 0 : i32
    %c0_i32_0 = arith.constant 0 : i32
    return %arg0, %arg1, %c0_i32 : i32, i32, i32
  }
  func.func @transform_2(%arg0: i32, %arg1: i32) -> (i32, i32, i32, i32) {
    %c0_i32 = arith.constant 0 : i32
    %c0_i32_0 = arith.constant 0 : i32
    %c0_i32_1 = arith.constant 0 : i32
    %c0_i32_2 = arith.constant 0 : i32
    return %arg0, %c0_i32, %c0_i32_0, %c0_i32_1 : i32, i32, i32, i32
  }
  func.func @transform_3(%arg0: i32, %arg1: i32) -> (i32, i32, i32, i32) {
    %c0_i32 = arith.constant 0 : i32
    %c0_i32_0 = arith.constant 0 : i32
    %c0_i32_1 = arith.constant 0 : i32
    %c0_i32_2 = arith.constant 0 : i32
    return %arg0, %c0_i32, %c0_i32_0, %c0_i32_1 : i32, i32, i32, i32
  }
  func.func @transform_4(%arg0: i32, %arg1: i32) -> (i32, i32, i32, i32) {
    %c0_i32 = arith.constant 0 : i32
    %c0_i32_0 = arith.constant 0 : i32
    %c0_i32_1 = arith.constant 0 : i32
    %c0_i32_2 = arith.constant 0 : i32
    return %arg0, %c0_i32, %c0_i32_0, %c0_i32_1 : i32, i32, i32, i32
  }
  func.func @transform_5(%arg0: i32, %arg1: i32) -> (i32, i32, i32) {
    %c0_i32 = arith.constant 0 : i32
    %c0_i32_0 = arith.constant 0 : i32
    %c0_i32_1 = arith.constant 0 : i32
    return %arg0, %c0_i32, %c0_i32_0 : i32, i32, i32
  }
}

</mosaic_0001>

<bundles_post_ra>
// kernel: tpu_custom_call.1
= control target key start
LH: loop header
LB: loop body
LE: loop exit
PB: predicated region body
PF: predicated region fallthrough
CT: control target
= control target key end

     0   :  { %s1428_s0 = inlined_call_operand.hbm [shape: f32[2,4,8,128], index: 0, kind: input, shape index: {}]   ;;  %s1429_s1 = inlined_call_operand.hbm [shape: s32[2,8,128], index: 1, kind: input, shape index: {}]   ;;  %s1430_s2 = inlined_call_operand.hbm [shape: f32[2,4,8,128], index: 2, kind: output, shape index: {0}]   ;;  %s1431_s3 = inlined_call_operand.hbm [shape: f32[2,4,8,128], index: 3, kind: output, shape index: {1}]   ;;  %s1432_s4 = inlined_call_operand.hbm [shape: f32[2,4,8,128], index: 4, kind: output, shape index: {2}]   ;;  %s1433_s5 = inlined_call_operand.hbm [shape: f32[2,8,128], index: 5, kind: output, shape index: {3}]  }
   0x1   :  { %1438 = sst [smem:[#allocation21_spill]] %s1428_s0 }
   0x2   :  { %1439 = sst [smem:[#allocation22_spill]] %s1429_s1 }
   0x3   :  { %11 = vsyncpa [#allocation3], 0 }
   0x4   :  { %13 = vsyncpa [#allocation3 + $0x1], 0 }
   0x5   :  { %14 = vsyncpa [#allocation6], 0 }
   0x6   :  { %16 = vsyncpa [#allocation6 + $0x1], 0 }
   0x7   :  { %17 = vsyncpa [#allocation4], 0 }
   0x8   :  { %19 = vsyncpa [#allocation4 + $0x1], 0 }
   0x9   :  { %20 = vsyncpa [#allocation9], 0 }
   0xa   :  { %22 = vsyncpa [#allocation9 + $0x1], 0 }
   0xb   :  { %23 = vsyncpa [#allocation12], 0 }
   0xc   :  { %25 = vsyncpa [#allocation12 + $0x1], 0  ;;  %s1158_s18 = smov 0   ;;  %s1160_s19 = smov 0  }
   0xd   :  { %s1162_s20 = smov 0   ;;  %s1164_s21 = smov 0  }
   0xe   :  { %s1166_s22 = smov 0   ;;  %s1168_s23 = smov 0  }
   0xf LB: > { %1440 = sst [smem:[#allocation18_spill]] %s1117_s22  ;;  %s1189_s24 = sadd.s32 4294967295, %s1121_s23   ;;  %s1121_s23 = sphi %s1168_s23, %s31_s23   ;;  %s1117_s22 = sphi %s1166_s22, %s1455_s22   ;;  %s1113_s21 = sphi %s1164_s21, %s1454_s21   ;;  %s1109_s20 = sphi %s1162_s20, %s1458_s20   ;;  %s1105_s19 = sphi %s1160_s19, %s1457_s19   ;;  %s1101_s18 = sphi %s1158_s18, %s1456_s18  }
  0x10   : > { %s1434_s25 = sadd.s32 4294967294, %s1121_s23   ;;  %s43_s26 = sadd.s32 1, %s1117_s22 }
  0x11   : > { %s52_s27 = sadd.s32 1, %s1109_s20  ;;  %p45_p0 = scmp.ge.s32.totalorder %s43_s26, 2 }
  0x12   : > { %p59_p1 = scmp.ne.s32.totalorder %s1109_s20, %s1105_s19  ;;  %p60_p2 = scmp.eq.s32.totalorder %s1121_s23, 0 }
  0x13   : > { %p65_p3 = scmp.ne.s32.totalorder %s1105_s19, %s1101_s18  ;;  %s1460_s26 = smov (%p45_p0, %s43_s26), 0 }
  0x14   : > { %1441 = sst [smem:[#allocation19_spill]] %s1460_s26  ;;  %p1201_p4 = por %p60_p2, %p59_p1 }
  0x15   : > { %p66_p5 = scmp.eq.s32.totalorder %s1189_s24, 0  ;;  %s47_s29 = ssub.s32 %s1117_s22, %s1460_s26 }
  0x16   : > { %p117_p6 = scmp.eq.s32.totalorder %s1189_s24, 1  ;;  %p50_p7 = scmp.eq.s32.totalorder %s47_s29, 0 }
  0x17   : > { %p1209_p8 = por %p66_p5, %p65_p3  ;;  %p123_p10 = scmp.eq.s32.totalorder %s1434_s25, 1 }
  0x18   : > { %p1213_p9 = por %p117_p6, %p59_p1  ;;  %p732_p12 = scmp.ge.s32.totalorder %s1121_s23, 2 }
  0x19   : > { %s1220_s7 = scalar_select %p50_p7, %s1109_s20, %s52_s27  }
  0x1a   : > { %p1222_p11 = por %p123_p10, %p65_p3  ;;  %p816_p13 = scmp.lt.s32.totalorder %s1121_s23, 2 }
  0x1b   : > { %1445 = sst [smem:[#allocation20_spill]] %s1220_s7  ;;  %s221_s9 = sand.u32 1, %s1109_s20  }
  0x1c   : > { %s733_s10 = sshll.u32 %s221_s9, 5  ;;  %s780_s11 = sshll.u32 %s1117_s22, 5 }
  0x1d   : > { %s1447_s0 = sld [smem:[#allocation21_spill]]  ;;  %s225_s15 = scalar_lea.vmem [#allocation2], %s733_s10 }
  0x1e   : > { %s234_s16 = sshll.u32 %s225_s15, 4  ;;  %p1235_p0 = pnand %p816_p13, %p1201_p4  ;;  %s235_s16 = int_to_ptr.vmem [resolvable:$true] %s234_s16 }
  0x1f   : > { %p738_p1 = scmp.ge.s32.totalorder %s1121_s23, 1  ;;  %s222_s29 = scalar_lea.sflag [#allocation3], %s221_s9 }
  0x20   : > { %s1123_s25 = smov 128   ;;  %s1124_s26 = smov 8  }
  0x21   : > { %p262_p2 = scmp.lt.s32.totalorder %s1121_s23, 3  ;;  %s737_s10 = sshll.u32 %s1117_s22, 3 }
  0x22   : > { %s1449_s1 = sld [smem:[#allocation22_spill]]  ;;  %s245_s7 = scalar_lea.sflag [#allocation6], %s221_s9 }
  0x23   : > { %s231_s14 = scalar_lea.hbm %s1447_s0, %s780_s11  ;;  %s736_s11 = sshll.u32 %s221_s9, 3 }
  0x24   : > { %s232_s17 = sshll.u32 %s231_s14, 4  ;;  %p263_p3 = pnand %p738_p1, %p262_p2  ;;  %s233_s17 = int_to_ptr.hbm [resolvable:$true] %s232_s17 }
  0x25   : > { %799 = dma.hbm_to_vmem [thread:$0]  (!%p1235_p0), %s233_s17, 512, %s235_s16, %s222_s29, %s1123_s25, %s1123_s25, %s1124_s26  }
  0x26   : > { %s248_s14 = scalar_lea.vmem [#allocation5], %s736_s11  ;;  %266 = sbr.rel (%p263_p3) target bundleno = 129 (0x81), region = 28 }
  0x27   : > { %s257_s15 = sshll.u32 %s248_s14, 4  ;;  %s1250_s25 = sand.u32 (!%p263_p3), 1, %s1105_s19   ;;  %s258_s15 = int_to_ptr.vmem [resolvable:$true] %s257_s15 }
  0x28   : > { %s253_s28 = scalar_lea.hbm %s1449_s1, %s737_s10  ;;  %s1253_s26 = sshll.u32 (!%p263_p3), %s1250_s25, 5 }
  0x29   : > { %s255_s0 = sshll.u32 %s253_s28, 4  ;;  %s269_s16 = scalar_lea.sflag (!%p263_p3), [#allocation3], %s1250_s25  ;;  %s256_s0 = int_to_ptr.hbm [resolvable:$true] %s255_s0 }
  0x2a   : > { %802 = dma.hbm_to_vmem [thread:$0]  (!%p1235_p0), %s256_s0, 128, %s258_s15, %s245_s7  }
  0x2b   : > { %s272_s17 = scalar_lea.vmem [#allocation2], %s1253_s26 }
  0x2c   : > { %1080 = dma.done.wait (%p1209_p8), %s269_s16, 512  }
  0x2d   : > { %1082 = vsyncadd (%p1209_p8), %s269_s16, 4294966784  ;;  %s1436_s0 = sshll.u32 %s1250_s25, 3  ;;  %s279_s7 = scalar_lea.sflag [#allocation6], %s1250_s25 }
  0x2e   : > { %s282_s9 = scalar_lea.vmem [#allocation5], %s1436_s0 }
  0x2f   : > { %1084 = dma.done.wait (%p1209_p8), %s279_s7, 128  }
  0x30   : > { %1086 = vsyncadd (%p1209_p8), %s279_s7, 4294967168  ;;  %v347_v0 = vld [vmem:[%s272_s17] sm:$0xff]  ;;  %v348_v1 = vld [vmem:[%s272_s17 + $0x8] sm:$0xff]  ;;  %v1125_v8 = vmov 0.0   ;;  %s1273_s30 = scalar_lea.vmem [#allocation10], %s1253_s26  ;;  %s1283_s27 = sshll.u32 %s1113_s21, 5 }
  0x31   : > { %v349_v2 = vld [vmem:[%s272_s17 + $0x10] sm:$0xff]  ;;  %v350_v3 = vld [vmem:[%s272_s17 + $0x18] sm:$0xff]  ;;  %v352_v4 = vmax.f32 %v347_v0, %v348_v1  ;;  %v351_v5 = vld [vmem:[%s282_s9] sm:$0xff]  ;;  %s491_s12 = scalar_lea.hbm %s1431_s3, %s1283_s27  ;;  %s315_s13 = scalar_lea.vmem [#allocation8], %s1253_s26 }
  0x32   : > { %v353_v6 = vmax.f32 %v349_v2, %v350_v3  ;;  %vm406_vm0 = vcmp.eq.s32.totalorder %v351_v5, 2  ;;  %vm373_vm1 = vcmp.eq.s32.totalorder %v351_v5, 0  ;;  %vm388_vm2 = vcmp.eq.s32.totalorder %v351_v5, 1  ;;  %s492_s28 = sshll.u32 %s315_s13, 4  ;;  %s1293_s14 = sshll.u32 %s491_s12, 4  ;;  %s1295_s28 = int_to_ptr.vmem [resolvable:$true] %s492_s28  ;;  %s495_s14 = int_to_ptr.hbm [resolvable:$true] %s1293_s14 }
  0x33   : > { %v745_v9 = vsel %vm373_vm1, 1.0, %v1125_v8  ;;  %vm424_vm3 = vcmp.eq.s32.totalorder %v351_v5, 3  ;;  %v746_v10 = vsel %vm388_vm2, 1.0, %v1125_v8  ;;  %v753_v11 = vsel %vm406_vm0, 1.0, %v1125_v8  ;;  %s777_s15 = sshll.u32 %s1113_s21, 3  ;;  %s508_s7 = scalar_lea.hbm %s1432_s4, %s1283_s27 }
  0x34   : > { %v354_v7 = vmax.f32 %v352_v4, %v353_v6  ;;  %386 = vst [vmem:[%s1273_s30] sm:$0xff] %v745_v9  ;;  %v760_v16 = vsel %vm424_vm3, 1.0, %v1125_v8  ;;  %v387_v28 = vsel %vm373_vm1, %v347_v0, 0.0  ;;  %s474_s10 = scalar_lea.hbm %s1430_s2, %s1283_s27  ;;  %s308_s12 = scalar_lea.vmem [#allocation7], %s1253_s26 }
  0x35   : > { %752 = vst [vmem:[%s1273_s30 + $0x8] sm:$0xff] %v746_v10  ;;  %v405_v29 = vsel %vm388_vm2, %v348_v1, %v387_v28  ;;  %s475_s29 = sshll.u32 %s308_s12, 4  ;;  %s524_s1 = scalar_lea.hbm %s1433_s5, %s777_s15  ;;  %s1315_s29 = int_to_ptr.vmem [resolvable:$true] %s475_s29 }
  0x36   : > { %v355_v12 = vsub.f32 %v347_v0, %v354_v7  ;;  %v356_v13 = vsub.f32 %v348_v1, %v354_v7  ;;  %v357_v14 = vsub.f32 %v349_v2, %v354_v7  ;;  %v358_v15 = vsub.f32 %v350_v3, %v354_v7  ;;  %759 = vst [vmem:[%s1273_s30 + $0x10] sm:$0xff] %v753_v11  ;;  %s1311_s22 = sshll.u32 %s508_s7, 4  ;;  %s1313_s16 = sshll.u32 %s474_s10, 4  ;;  %s478_s16 = int_to_ptr.hbm [resolvable:$true] %s1313_s16  ;;  %s512_s22 = int_to_ptr.hbm [resolvable:$true] %s1311_s22 }
  0x37   : > { %766 = vst [vmem:[%s1273_s30 + $0x18] sm:$0xff] %v760_v16  ;;  %v423_v30 = vsel %vm406_vm0, %v349_v2, %v405_v29  ;;  %s509_s26 = sshll.u32 %s1273_s30, 4  ;;  %s1450_s27 = sshll.u32 %s1250_s25, 3  ;;  %s1322_s26 = int_to_ptr.vmem [resolvable:$true] %s509_s26 }
  0x38   : > { %v359_v17 = vmul.f32 1.442695, %v355_v12  ;;  %v361_v18 = vmul.f32 1.442695, %v356_v13  ;;  %v363_v19 = vmul.f32 1.442695, %v357_v14  ;;  %v441_v38 = vsel %vm424_vm3, %v350_v3, %v423_v30 }
  0x39   : > { %v365_v20 = vmul.f32 1.442695, %v358_v15  ;;  %s329_s17 = scalar_lea.vmem [#allocation11], %s1450_s27  ;;  %s528_s0 = sshll.u32 %s524_s1, 4  ;;  %s1326_s0 = int_to_ptr.hbm [resolvable:$true] %s528_s0 }
  0x3a   : > { %871 = vpow2.f32 %v359_v17  ;;  %s526_s9 = sshll.u32 %s329_s17, 4  ;;  %s957_s30 = sshra.s32 %s495_s14, 4  ;;  %s1324_s9 = int_to_ptr.vmem [resolvable:$true] %s526_s9  ;;  %s958_s30 = int_to_ptr.hbm [resolvable:$true] %s957_s30 }
  0x3b   : > { %873 = vpow2.f32 %v361_v18  ;;  %s959_s7 = scalar_lea.hbm %s958_s30, 32  ;;  %s963_s10 = scalar_lea.hbm %s1431_s3, 64 }
  0x3c   : > { %875 = vpow2.f32 %v363_v19  ;;  %p960_p4 = scmp.ne.s32.totalorder %s958_s30, %s959_s7  ;;  %p964_p7 = scmp.lt.s32.totalorder %s958_s30, %s1431_s3 }
  0x3d   : > { %877 = vpow2.f32 %v365_v20  ;;  %p965_p8 = scmp.lt.s32.totalorder %s963_s10, %s959_s7 }
  0x3e   : > { %p961_p5 = pnand %p960_p4, %p1213_p9 }
  0x3f   : > { %p966_p10 = por %p965_p8, %p964_p7 }
  0x40   : > { %v872_v21 = vpop.eup %871  ;;  %p962_p6 = pneg %p961_p5 }
  0x41   : > { %v874_v22 = vpop.eup %873 }
  0x42   : > { %v876_v23 = vpop.eup %875  ;;  %v367_v24 = vadd.f32 %v874_v22, %v872_v21  ;;  %p967_p13 = pnand %p966_p10, %p962_p6 }
  0x43   : > { %v878_v25 = vpop.eup %877 }
  0x44   : > { %v368_v26 = vadd.f32 %v876_v23, %v367_v24 }
  0x46   : > { %v369_v27 = vadd.f32 %v878_v25, %v368_v26 }
  0x48   : > { %879 = vrcp.f32 %v369_v27 }
  0x49   : > { %881 = vlog2.f32 %v369_v27 }
  0x4e   : > { %v880_v31 = vpop.eup %879 }
  0x4f   : > { %v882_v32 = vpop.eup %881  ;;  %v376_v33 = vmul.f32 %v880_v31, %v872_v21  ;;  %v391_v34 = vmul.f32 %v880_v31, %v874_v22  ;;  %v409_v35 = vmul.f32 %v880_v31, %v876_v23  ;;  %v427_v36 = vmul.f32 %v880_v31, %v878_v25 }
  0x50   : > { %v372_v37 = vmul.f32 0.6931472, %v882_v32 }
  0x51   : > { %v378_v39 = vmul.f32 %v745_v9, %v376_v33  ;;  %v394_v40 = vmul.f32 %v746_v10, %v391_v34  ;;  %v412_v41 = vmul.f32 %v753_v11, %v409_v35  ;;  %v430_v42 = vmul.f32 %v760_v16, %v427_v36  ;;  %383 = vst [vmem:[%s315_s13] sm:$0xff] %v376_v33 }
  0x52   : > { %v442_v43 = vadd.f32 %v372_v37, %v354_v7  ;;  %750 = vst [vmem:[%s315_s13 + $0x8] sm:$0xff] %v391_v34 }
  0x53   : > { %757 = vst [vmem:[%s315_s13 + $0x10] sm:$0xff] %v409_v35 }
  0x54   : > { %v443_v44 = vsub.f32 %v442_v43, %v441_v38  ;;  %764 = vst [vmem:[%s315_s13 + $0x18] sm:$0xff] %v427_v36  ;;  %s1451_s13 = sand.u32 1, %s1189_s24  }
  0x55   : > { %380 = vst [vmem:[%s308_s12] sm:$0xff] %v378_v39  ;;  %s1330_s15 = scalar_lea.sflag [#allocation9], %s1451_s13 }
  0x56   : > { %748 = vst [vmem:[%s308_s12 + $0x8] sm:$0xff] %v394_v40 }
  0x57   : > { %755 = vst [vmem:[%s308_s12 + $0x10] sm:$0xff] %v412_v41 }
  0x58   : > { %762 = vst [vmem:[%s308_s12 + $0x18] sm:$0xff] %v430_v42 }
  0x59   : > { %446 = vst [vmem:[%s329_s17] sm:$0xff] %v443_v44 }
  0x5a   : > { %970 = shalt.err (!%p967_p13)
}
  0x5b   : > { %s1126_s24 = smov 128   ;;  %s1127_s27 = smov 8  }
  0x5c   : > { %789 = dma.vmem_to_hbm [thread:$0]  (%p1213_p9), %s1295_s28, 512, %s495_s14, %s1330_s15, %s1126_s24, %s1126_s24, %s1127_s27  }
  0x5d   : > { %s448_s17 = scalar_lea.sflag [#allocation4], %s1250_s25  ;;  %s985_s13 = sshra.s32 %s478_s16, 4  ;;  %s986_s13 = int_to_ptr.hbm [resolvable:$true] %s985_s13 }
  0x5e   : > { %s987_s30 = scalar_lea.hbm %s986_s13, 32  ;;  %s991_s11 = scalar_lea.hbm %s1430_s2, 64 }
  0x5f   : > { %p988_p0 = scmp.ne.s32.totalorder %s986_s13, %s987_s30  ;;  %p992_p3 = scmp.lt.s32.totalorder %s986_s13, %s1430_s2 }
  0x60   : > { %p993_p4 = scmp.lt.s32.totalorder %s991_s11, %s987_s30 }
  0x61   : > { %p989_p1 = pnand %p988_p0, %p1213_p9 }
  0x62   : > { %p994_p5 = por %p993_p4, %p992_p3 }
  0x63   : > { %p990_p2 = pneg %p989_p1 }
  0x65   : > { %p995_p6 = pnand %p994_p5, %p990_p2 }
  0x67   : > { %998 = shalt.err (!%p995_p6)
}
  0x68   : > { %788 = dma.vmem_to_hbm [thread:$0]  (%p1213_p9), %s1315_s29, 512, %s478_s16, %s448_s17, %s1126_s24, %s1126_s24, %s1127_s27  }
  0x69   : > { %s1013_s28 = sshra.s32 %s512_s22, 4  ;;  %s1019_s30 = scalar_lea.hbm %s1432_s4, 64  ;;  %s1014_s28 = int_to_ptr.hbm [resolvable:$true] %s1013_s28 }
  0x6a   : > { %s1015_s14 = scalar_lea.hbm %s1014_s28, 32  ;;  %p1020_p13 = scmp.lt.s32.totalorder %s1014_s28, %s1432_s4 }
  0x6b   : > { %p1016_p7 = scmp.ne.s32.totalorder %s1014_s28, %s1015_s14  ;;  %p1021_p0 = scmp.lt.s32.totalorder %s1019_s30, %s1015_s14 }
  0x6d   : > { %p1017_p8 = pnand %p1016_p7, %p1213_p9  ;;  %p1022_p1 = por %p1021_p0, %p1020_p13 }
  0x6f   : > { %p1018_p10 = pneg %p1017_p8 }
  0x71   : > { %p1023_p2 = pnand %p1022_p1, %p1018_p10 }
  0x73   : > { %1026 = shalt.err (!%p1023_p2)
}
  0x74   : > { %790 = dma.vmem_to_hbm [thread:$0]  (%p1213_p9), %s1322_s26, 512, %s512_s22, %s1330_s15, %s1126_s24, %s1126_s24, %s1127_s27  }
  0x75   : > { %s463_s29 = scalar_lea.sflag [#allocation12], %s1250_s25  ;;  %s1041_s16 = sshra.s32 %s1326_s0, 4  ;;  %s1042_s16 = int_to_ptr.hbm [resolvable:$true] %s1041_s16 }
  0x76   : > { %s1043_s17 = scalar_lea.hbm %s1042_s16, 8  ;;  %s1047_s12 = scalar_lea.hbm %s1433_s5, 16 }
  0x77   : > { %p1044_p3 = scmp.ne.s32.totalorder %s1042_s16, %s1043_s17  ;;  %p1048_p6 = scmp.lt.s32.totalorder %s1042_s16, %s1433_s5 }
  0x78   : > { %p1049_p7 = scmp.lt.s32.totalorder %s1047_s12, %s1043_s17 }
  0x79   : > { %p1045_p4 = pnand %p1044_p3, %p1213_p9 }
  0x7a   : > { %p1050_p8 = por %p1049_p7, %p1048_p6 }
  0x7b   : > { %p1046_p5 = pneg %p1045_p4 }
  0x7d   : > { %p1051_p10 = pnand %p1050_p8, %p1046_p5 }
  0x7f   : > { %1054 = shalt.err (!%p1051_p10)
}
  0x80   : > { %791 = dma.vmem_to_hbm [thread:$0]  (%p1213_p9), %s1324_s9, 128, %s1326_s0, %s463_s29  }
  0x81 PF: > { %s540_s22 = sand.u32 1, %s1101_s18   ;;  %p804_p13 = pnand %p732_p12, %p1222_p11 }
  0x82   : > { %s541_s25 = scalar_lea.sflag [#allocation4], %s540_s22 }
  0x83   : > { %p805_p0 = pneg %p804_p13 }
  0x85   : > { %1088 = dma.done.wait (%p805_p0), %s541_s25, 512  }
  0x86   : > { %1090 = vsyncadd (%p805_p0), %s541_s25, 4294966784  ;;  %s1452_s26 = sadd.s32 4294967294, %s1121_s23  }
  0x87   : > { %s550_s15 = sand.u32 1, %s1452_s26  }
  0x88   : > { %s551_s24 = scalar_lea.sflag [#allocation9], %s550_s15 }
  0x89   : > { %1092 = dma.done.wait (%p805_p0), %s551_s24, 1024  }
  0x8a   : > { %1094 = vsyncadd (%p805_p0), %s551_s24, 4294966272  ;;  %s571_s6 = scalar_lea.sflag [#allocation12], %s540_s22 }
  0x8b   : > { %1096 = dma.done.wait (%p805_p0), %s571_s6, 128  }
  0x8c   : > { %1098 = vsyncadd (%p805_p0), %s571_s6, 4294967168  ;;  %s31_s23 = sadd.s32 1, %s1121_s23   ;;  %s1453_s8 = sld [smem:[#allocation20_spill]] }
  0x8d   : > { %p28_p9 = scmp.ge.s32.totalorder %s31_s23, 4   ;;  %s1454_s21 = sld [smem:[#allocation18_spill]] }
  0x8e   : > { %s1455_s22 = sld [smem:[#allocation19_spill]]  ;;  %s1456_s18 = smov %s1105_s19 }
  0x8f   : > { %s1457_s19 = smov %s1109_s20  ;;  %30 = sbr.rel (!%p28_p9) target bundleno = 15 (0xf), region = 148 }
  0x92   : > { %s1458_s20 = smov %s1453_s8 }
  0x94   :  { %577 = vsyncpa [#allocation3], 1 }
  0x95   :  { %579 = vsyncpa [#allocation3 + $0x1], 1 }
  0x96   :  { %580 = vsyncpa [#allocation6], 1 }
  0x97   :  { %582 = vsyncpa [#allocation6 + $0x1], 1 }
  0x98   :  { %583 = vsyncpa [#allocation4], 1 }
  0x99   :  { %585 = vsyncpa [#allocation4 + $0x1], 1 }
  0x9a   :  { %586 = vsyncpa [#allocation9], 1 }
  0x9b   :  { %588 = vsyncpa [#allocation9 + $0x1], 1 }
  0x9c   :  { %589 = vsyncpa [#allocation12], 1 }
  0x9d   :  { %591 = vsyncpa [#allocation12 + $0x1], 1 }

</bundles_post_ra>
